<compile_context>
chip_gen: v7x
topology: tpu7x:2x2x1
jax: 0.10.0
libtpu: 0.0.40
codegen_flags: <defaults>
</compile_context>

<pallas_src>
import functools

import jax
import jax.numpy as jnp
from jax.experimental import pallas as pl
from jax.experimental.pallas import tpu as pltpu

# ------------------------------ hyperparameters ------------------------------
NUM_METAPATHS = 2
NUM_EDGE_TYPE = 4                 # unused for rnn_type='average' (r_vec is None)
ETYPES_LIST = [[0, 1], [2, 3]]    # unused for rnn_type='average'
FEATS_DIM_LIST = [10, 12, 14]
HIDDEN_DIM = 32
OUT_DIM = 4
NUM_HEADS = 2
ATTN_VEC_DIM = 16
EMB_DIM = 8
RNN_TYPE = 'average'
NODE_TYPE_SRC = 0

DMAX = max(FEATS_DIM_LIST)        # common zero-padded input feature dim

VMEM = functools.partial(pl.BlockSpec, memory_space=pltpu.MemorySpace.VMEM)


# ------------------------- K1: fused per-type projections --------------------
def _fc_list_kernel(x_ref, w_ref, b_ref, o_ref):
    # One node type per grid step: y = x @ W + b, with W stored (in, out) and
    # zero-padded along the in-dim (padded feature columns are zero too).
    o_ref[0] = (
        jnp.dot(x_ref[0], w_ref[0], preferred_element_type=jnp.float32) + b_ref[0]
    )


def fc_list_project(feats_pad, w_pack, b_pack):
    n_types, nmax, dmax = feats_pad.shape
    hid = w_pack.shape[-1]
    return pl.pallas_call(
        _fc_list_kernel,
        grid=(n_types,),
        in_specs=[
            pl.BlockSpec((1, nmax, dmax), lambda i: (i, 0, 0)),
            pl.BlockSpec((1, dmax, hid), lambda i: (i, 0, 0)),
            pl.BlockSpec((1, 1, hid), lambda i: (i, 0, 0)),
        ],
        out_specs=pl.BlockSpec((1, nmax, hid), lambda i: (i, 0, 0)),
        out_shape=jax.ShapeDtypeStruct((n_types, nmax, hid), jnp.float32),
        compiler_params=pltpu.CompilerParams(dimension_semantics=("parallel",)),
    )(feats_pad, w_pack, b_pack)


# -------------------- K2: HGNN_AC (all heads fused, row-tiled) ---------------
def _hgnn_ac_kernel(emb_dst_ref, emb_src_ref, feat_src_ref, w_ref, w2_ref, o_ref,
                    *, num_heads):
    dst = emb_dst_ref[...].astype(jnp.bfloat16)
    src = emb_src_ref[...].astype(jnp.bfloat16)
    feat = feat_src_ref[...].astype(jnp.bfloat16)
    acc = jnp.zeros(o_ref.shape, jnp.float32)
    for h in range(num_heads):
        w_h = w_ref[h].astype(jnp.bfloat16)
        w2_h = w2_ref[h].astype(jnp.bfloat16)
        h1 = jnp.dot(src, w_h, preferred_element_type=jnp.float32)    # (Ns, A)
        h2 = jnp.dot(dst, w_h, preferred_element_type=jnp.float32)    # (TM, A)
        h2w2 = jnp.dot(h2.astype(jnp.bfloat16), w2_h,
                       preferred_element_type=jnp.float32)            # (TM, A)
        # e = (h2 @ W2) @ h1^T, contracting the attn_vec dim of both operands
        # (no explicit in-kernel transpose).
        e = jax.lax.dot_general(
            h2w2.astype(jnp.bfloat16), h1.astype(jnp.bfloat16),
            dimension_numbers=(((1,), (1,)), ((), ())),
            preferred_element_type=jnp.float32)                       # (TM, Ns)
        e = jnp.where(e > 0, e, 0.2 * e)                              # LeakyReLU(0.2)
        e = e - jnp.max(e, axis=1, keepdims=True)                     # softmax over src
        p = jnp.exp(e)
        att = p * pl.reciprocal(jnp.sum(p, axis=1, keepdims=True), approx=True)
        # attention dropout: identity (eval mode)
        h_prime = jnp.dot(att.astype(jnp.bfloat16), feat,
                          preferred_element_type=jnp.float32)         # (TM, D)
        acc = acc + jax.nn.sigmoid(h_prime)                           # activation
    o_ref[...] = acc * (1.0 / num_heads)                              # mean over heads


def hgnn_ac(emb_dest, emb_src, feat_src, w_heads, w2_heads, *, row_tile=8):
    nd, e_dim = emb_dest.shape
    ns = emb_src.shape[0]
    d = feat_src.shape[1]
    num_heads, _, a_dim = w_heads.shape
    nd_pad = ((nd + row_tile - 1) // row_tile) * row_tile
    if nd_pad != nd:
        emb_dest = jnp.pad(emb_dest, ((0, nd_pad - nd), (0, 0)))
    out = pl.pallas_call(
        functools.partial(_hgnn_ac_kernel, num_heads=num_heads),
        grid=(nd_pad // row_tile,),
        in_specs=[
            pl.BlockSpec((row_tile, e_dim), lambda i: (i, 0)),        # streamed
            pl.BlockSpec((ns, e_dim), lambda i: (0, 0)),              # resident
            pl.BlockSpec((ns, d), lambda i: (0, 0)),                  # resident
            pl.BlockSpec((num_heads, e_dim, a_dim), lambda i: (0, 0, 0)),
            pl.BlockSpec((num_heads, a_dim, a_dim), lambda i: (0, 0, 0)),
        ],
        out_specs=pl.BlockSpec((row_tile, d), lambda i: (i, 0)),
        out_shape=jax.ShapeDtypeStruct((nd_pad, d), jnp.float32),
        compiler_params=pltpu.CompilerParams(
            dimension_semantics=("parallel",),        # sharded across TCs on v7x
            vmem_limit_bytes=48 * 1024 * 1024,        # fits v7x's 64 MiB VMEM
        ),
    )(emb_dest, emb_src, feat_src, w_heads, w2_heads)
    return out[:nd]


# --------- K3: intra-metapath attention (all metapaths, in-kernel gather) ----
def _metapath_layer_kernel(idx_ref, x_ref, attn_t_ref, o_ref, *,
                           num_paths, num_heads, path_lens, k_inst, t_tile,
                           t_total, hidden_dim):
    tile = pl.program_id(0)
    base = 0
    for p in range(num_paths):
        lp = path_lens[p]
        inv_lp = 1.0 / float(lp)
        attn_p = attn_t_ref[p].astype(jnp.bfloat16)                   # (D, H)
        # --- in-kernel gather + metapath-instance encoding (rnn_type='average')
        hid_ks = []
        for k in range(k_inst):
            rows = []
            for tl in range(t_tile):
                row = jnp.zeros((1, hidden_dim), jnp.float32)
                for l in range(lp):
                    flat = base + ((tile * t_tile + tl) * k_inst + k) * lp + l
                    row = row + x_ref[pl.ds(idx_ref[flat], 1), :]
                rows.append(row * inv_lp)
            hid_ks.append(jnp.concatenate(rows, axis=0))              # (t_tile, D)
        # --- per-instance attention scores on the MXU: (t_tile, D) @ (D, H) ---
        scores_ks = [
            jnp.dot(hid.astype(jnp.bfloat16), attn_p,
                    preferred_element_type=jnp.float32)               # (t_tile, H)
            for hid in hid_ks
        ]
        head_outs = []
        for h in range(num_heads):
            s_h = jnp.concatenate([s[:, h:h + 1] for s in scores_ks], axis=1)
            s_h = jnp.where(s_h > 0, s_h, 0.01 * s_h)                 # LeakyReLU(0.01)
            s_h = s_h - jnp.max(s_h, axis=1, keepdims=True)           # edge softmax
            e_h = jnp.exp(s_h)
            att = e_h * pl.reciprocal(jnp.sum(e_h, axis=1, keepdims=True),
                                      approx=True)                    # (t_tile, K)
            # attention dropout: identity (eval mode)
            out_h = att[:, 0:1] * hid_ks[0]
            for k in range(1, k_inst):
                out_h = out_h + att[:, k:k + 1] * hid_ks[k]           # (t_tile, D)
            head_outs.append(jnp.where(out_h > 0, out_h, jnp.exp(out_h) - 1.0))  # F.elu
        # lane-dense (t_tile, H*D) store, matches .view(-1, num_heads*out_dim)
        o_ref[p, :, :] = jnp.concatenate(head_outs, axis=-1)
        base += t_total * k_inst * lp


def metapath_layer(transformed, attn_t, idx_flat, *, num_paths, num_heads,
                   path_lens, k_inst, t_total, hidden_dim):
    n_nodes = transformed.shape[0]
    hd = num_heads * hidden_dim
    t_tile = 8 if (t_total >= 8 and t_total % 8 == 0) else t_total
    # TODO(synk): pad T to a multiple of the tile for arbitrary minibatch sizes.
    grid_spec = pltpu.PrefetchScalarGridSpec(
        num_scalar_prefetch=1,                      # flattened indices -> SMEM
        grid=(t_total // t_tile,),
        in_specs=[
            pl.BlockSpec((n_nodes, hidden_dim), lambda i, idx: (0, 0)),   # resident
            pl.BlockSpec((num_paths, hidden_dim, num_heads),
                         lambda i, idx: (0, 0, 0)),
        ],
        out_specs=pl.BlockSpec((num_paths, t_tile, hd), lambda i, idx: (0, i, 0)),
    )
    return pl.pallas_call(
        functools.partial(_metapath_layer_kernel, num_paths=num_paths,
                          num_heads=num_heads, path_lens=tuple(path_lens),
                          k_inst=k_inst, t_tile=t_tile, t_total=t_total,
                          hidden_dim=hidden_dim),
        grid_spec=grid_spec,
        out_shape=jax.ShapeDtypeStruct((num_paths, t_total, hd), jnp.float32),
        compiler_params=pltpu.CompilerParams(dimension_semantics=("parallel",)),
    )(idx_flat, transformed, attn_t)


# ------------- K4: inter-metapath attention fused with the final fc ----------
def _inter_attn_fc_kernel(mouts_ref, fc1w_ref, fc1b_ref, fc2w_ref, fcw_ref, fcb_ref,
                          h_ref, logits_ref, *, num_paths):
    # beta_p = fc2(mean_T(tanh(fc1(m_p)))); softmax over metapaths; weighted sum;
    # logits = h @ fc_w + fc_b (fused in the same kernel).
    betas = []
    for p in range(num_paths):
        m = mouts_ref[p]                                              # (T, H*D)
        z = jnp.tanh(
            jnp.dot(m.astype(jnp.bfloat16), fc1w_ref[...].astype(jnp.bfloat16),
                    preferred_element_type=jnp.float32) + fc1b_ref[...])
        zm = jnp.mean(z, axis=0, keepdims=True)                       # (1, A)
        betas.append(jnp.sum(zm * fc2w_ref[...], axis=1, keepdims=True))  # (1, 1)
    bmax = betas[0]
    for p in range(1, num_paths):
        bmax = jnp.maximum(bmax, betas[p])
    exps = [jnp.exp(b - bmax) for b in betas]
    denom = exps[0]
    for p in range(1, num_paths):
        denom = denom + exps[p]
    inv = pl.reciprocal(denom, approx=True)
    h = mouts_ref[0] * (exps[0] * inv)
    for p in range(1, num_paths):
        h = h + mouts_ref[p] * (exps[p] * inv)
    h_ref[...] = h
    logits_ref[...] = (
        jnp.dot(h.astype(jnp.bfloat16), fcw_ref[...].astype(jnp.bfloat16),
                preferred_element_type=jnp.float32) + fcb_ref[...])


def inter_attn_and_fc(mouts, fc1_w, fc1_b, fc2_w, fc_w, fc_b):
    num_paths, t, hd = mouts.shape
    out_dim = fc_w.shape[1]
    return pl.pallas_call(
        functools.partial(_inter_attn_fc_kernel, num_paths=num_paths),
        in_specs=[VMEM() for _ in range(6)],
        out_specs=(VMEM(), VMEM()),
        out_shape=(jax.ShapeDtypeStruct((t, hd), jnp.float32),
                   jax.ShapeDtypeStruct((t, out_dim), jnp.float32)),
    )(mouts, fc1_w, fc1_b, fc2_w, fc_w, fc_b)


# ------------------------------ parameter init -------------------------------
def _xavier(key, shape, gain=1.414):
    fan_out, fan_in = shape[-2], shape[-1]
    std = gain * (2.0 / (fan_in + fan_out)) ** 0.5
    return (std * jax.random.normal(key, shape)).astype(jnp.float32)


def init_params(key):
    keys = iter(jax.random.split(key, 32))
    nxt = lambda: next(keys)
    params = {}
    n_types = len(FEATS_DIM_LIST)
    # fc_list: nn.Linear weights stored pre-transposed (in, out), zero-padded to a
    # common in-dim so all per-type projections run as one gridded kernel.
    w_pack = jnp.zeros((n_types, DMAX, HIDDEN_DIM), jnp.float32)
    b_pack = jnp.zeros((n_types, 1, HIDDEN_DIM), jnp.float32)
    for i, fd in enumerate(FEATS_DIM_LIST):
        w_pack = w_pack.at[i, :fd, :].set(_xavier(nxt(), (fd, HIDDEN_DIM)))
        b_pack = b_pack.at[i, 0, :].set(
            0.01 * jax.random.normal(nxt(), (HIDDEN_DIM,)).astype(jnp.float32))
    params['fc_pack'] = {'w': w_pack, 'b': b_pack}
    # self.fc (only applied for DBLP; kept for parameter fidelity, unused here)
    params['fc'] = {'w': _xavier(nxt(), (HIDDEN_DIM, HIDDEN_DIM)),
                    'b': jnp.zeros((HIDDEN_DIM,), jnp.float32)}
    # HGNN_AC: per-head W (emb -> attn_vec) and W2 (attn_vec -> attn_vec)
    params['hgnn_ac'] = {
        'W': _xavier(nxt(), (NUM_HEADS, EMB_DIM, ATTN_VEC_DIM)),
        'W2': _xavier(nxt(), (NUM_HEADS, ATTN_VEC_DIM, ATTN_VEC_DIM)),
    }
    hd = NUM_HEADS * HIDDEN_DIM
    params['layer1'] = {
        # intra-metapath attention vectors, stored pre-transposed as (P, D, H)
        'attn_t': _xavier(nxt(), (NUM_METAPATHS, HIDDEN_DIM, NUM_HEADS)),
        # nn.Linear weights stored pre-transposed (in_features, out_features)
        'fc1_w': _xavier(nxt(), (hd, ATTN_VEC_DIM)),
        'fc1_b': jnp.zeros((1, ATTN_VEC_DIM), jnp.float32),
        'fc2_w': _xavier(nxt(), (1, ATTN_VEC_DIM)),   # used elementwise (out=1)
        'fc_w': _xavier(nxt(), (hd, OUT_DIM)),
        'fc_b': jnp.zeros((1, OUT_DIM), jnp.float32),
    }
    return params


# --------------------------------- forward -----------------------------------
def magnn_nc_mb_forward(params, features_list, type_mask, emb, mask_list,
                        node_type_src, edge_metapath_indices_list):
    n_nodes = int(type_mask.shape[0])
    n_types = len(features_list)
    nmax = max(int(f.shape[0]) for f in features_list)

    # 1) per-type feature transformation, fused into one kernel over the types
    feats_pad = jnp.zeros((n_types, nmax, DMAX), jnp.float32)
    for i, feat in enumerate(features_list):
        feats_pad = feats_pad.at[i, :feat.shape[0], :feat.shape[1]].set(feat)
    proj = fc_list_project(feats_pad, params['fc_pack']['w'], params['fc_pack']['b'])
    transformed = jnp.zeros((n_nodes, HIDDEN_DIM), jnp.float32)
    for i, feat in enumerate(features_list):
        transformed = transformed.at[mask_list[i]].set(proj[i, :feat.shape[0], :])

    # 2) attribute completion (HGNN_AC), dataset == 'IMDB'/'ACM' branch
    emb_src = emb[mask_list[node_type_src]]
    feat_src = transformed[mask_list[node_type_src]]
    feature_src_re = hgnn_ac(emb, emb_src, feat_src,
                             params['hgnn_ac']['W'], params['hgnn_ac']['W2'])
    add_mask = (type_mask != node_type_src).astype(jnp.float32)[:, None]
    transformed = transformed + add_mask * feature_src_re
    # feat_drop: identity (eval mode); non-DBLP: no extra self.fc

    # 3) layer1: intra-metapath attention (all metapaths, in-kernel gather) then
    #    inter-metapath attention fused with the final fc
    t_total = int(edge_metapath_indices_list[0].shape[0])
    k_inst = int(edge_metapath_indices_list[0].shape[1])
    for idx in edge_metapath_indices_list:
        assert int(idx.shape[0]) == t_total and int(idx.shape[1]) == k_inst
    path_lens = [int(idx.shape[2]) for idx in edge_metapath_indices_list]
    idx_flat = jnp.concatenate(
        [idx.astype(jnp.int32).reshape(-1) for idx in edge_metapath_indices_list])

    mouts = metapath_layer(transformed, params['layer1']['attn_t'], idx_flat,
                           num_paths=NUM_METAPATHS, num_heads=NUM_HEADS,
                           path_lens=path_lens, k_inst=k_inst, t_total=t_total,
                           hidden_dim=HIDDEN_DIM)                     # (P, T, H*D)
    h, logits = inter_attn_and_fc(mouts,
                                  params['layer1']['fc1_w'],
                                  params['layer1']['fc1_b'],
                                  params['layer1']['fc2_w'],
                                  params['layer1']['fc_w'],
                                  params['layer1']['fc_b'])
    return logits, h


# ----------------------------------- main -------------------------------------
if __name__ == "__main__":
    key = jax.random.PRNGKey(0)
    k_params, k_feat, k_emb, k_idx = jax.random.split(key, 4)

    params = init_params(k_params)

    # synthetic heterogeneous graph: 3 node types with 6 / 5 / 5 nodes
    node_counts = [6, 5, 5]
    n_nodes = sum(node_counts)
    type_mask = jnp.array(
        sum([[i] * c for i, c in enumerate(node_counts)], []), dtype=jnp.int32
    )
    mask_list = []
    start = 0
    for c in node_counts:
        mask_list.append(jnp.arange(start, start + c, dtype=jnp.int32))
        start += c

    feat_keys = jax.random.split(k_feat, len(node_counts))
    features_list = [
        jax.random.normal(feat_keys[i], (node_counts[i], FEATS_DIM_LIST[i]),
                          dtype=jnp.float32)
        for i in range(len(node_counts))
    ]
    emb = jax.random.normal(k_emb, (n_nodes, EMB_DIM), dtype=jnp.float32)

    # minibatch: T target nodes, each with K metapath instances of length L_p
    T_TARGETS, K_INST = 4, 3
    metapath_lens = [3, 2]
    idx_keys = jax.random.split(k_idx, NUM_METAPATHS)
    edge_metapath_indices_list = [
        jax.random.randint(idx_keys[p], (T_TARGETS, K_INST, metapath_lens[p]),
                           0, n_nodes, dtype=jnp.int32)
        for p in range(NUM_METAPATHS)
    ]

    logits, h = magnn_nc_mb_forward(
        params, features_list, type_mask, emb, mask_list,
        NODE_TYPE_SRC, edge_metapath_indices_list,
    )
    jax.block_until_ready((logits, h))
    assert logits.shape == (T_TARGETS, OUT_DIM)
    assert h.shape == (T_TARGETS, NUM_HEADS * HIDDEN_DIM)
    print("KERNEL_OK")
</pallas_src>

<mosaic_0001>
module attributes {stable_mosaic.version = 11 : i64} {
  func.func @_fc_list_kernel(%arg0: i32, %arg1: memref<1x6x14xf32, #tpu.memory_space<vmem>>, %arg2: memref<1x14x32xf32, #tpu.memory_space<vmem>>, %arg3: memref<1x1x32xf32, #tpu.memory_space<vmem>>, %arg4: memref<1x6x32xf32, #tpu.memory_space<vmem>>) attributes {dimension_semantics = [#tpu.dimension_semantics<parallel>], iteration_bounds = array<i64: 3>, scalar_prefetch = 0 : i64, scratch_operands = 0 : i64, tpu.core_type = #tpu.core_type<tc>, window_params = [{transform_indices = @transform_0, window_bounds = array<i64: 1, 6, 14>}, {transform_indices = @transform_1, window_bounds = array<i64: 1, 14, 32>}, {transform_indices = @transform_2, window_bounds = array<i64: 1, 1, 32>}, {transform_indices = @transform_3, window_bounds = array<i64: 1, 6, 32>}]} {
    %c0 = arith.constant 0 : index
    %c0_0 = arith.constant 0 : index
    %c0_1 = arith.constant 0 : index
    %0 = vector.load %arg1[%c0, %c0_0, %c0_1] : memref<1x6x14xf32, #tpu.memory_space<vmem>>, vector<1x6x14xf32>
    %1 = vector.shape_cast %0 : vector<1x6x14xf32> to vector<6x14xf32>
    %c0_2 = arith.constant 0 : index
    %c0_3 = arith.constant 0 : index
    %c0_4 = arith.constant 0 : index
    %2 = vector.load %arg2[%c0_2, %c0_3, %c0_4] : memref<1x14x32xf32, #tpu.memory_space<vmem>>, vector<1x14x32xf32>
    %3 = vector.shape_cast %2 : vector<1x14x32xf32> to vector<14x32xf32>
    %cst = arith.constant dense<0.000000e+00> : vector<6x32xf32>
    %4 = tpu.matmul %1, %3, %cst {dimension_numbers = #tpu.dot_dimension_numbers<[1], [0], [0], [1], [0, 0, 1, 1], [], []>} : vector<6x14xf32>, vector<14x32xf32>, vector<6x32xf32> -> vector<6x32xf32>
    %c0_5 = arith.constant 0 : index
    %c0_6 = arith.constant 0 : index
    %c0_7 = arith.constant 0 : index
    %5 = vector.load %arg3[%c0_5, %c0_6, %c0_7] : memref<1x1x32xf32, #tpu.memory_space<vmem>>, vector<1x1x32xf32>
    %6 = vector.shape_cast %5 : vector<1x1x32xf32> to vector<1x32xf32>
    %7 = vector.broadcast %6 : vector<1x32xf32> to vector<6x32xf32>
    %8 = arith.addf %4, %7 : vector<6x32xf32>
    %c0_8 = arith.constant 0 : index
    %c0_9 = arith.constant 0 : index
    %c0_10 = arith.constant 0 : index
    %9 = vector.load %arg4[%c0_8, %c0_9, %c0_10] : memref<1x6x32xf32, #tpu.memory_space<vmem>>, vector<1x6x32xf32>
    %10 = vector.shape_cast %9 : vector<1x6x32xf32> to vector<6x32xf32>
    %11 = vector.shape_cast %8 : vector<6x32xf32> to vector<1x6x32xf32>
    tpu.vector_store %arg4[%c0_8, %c0_9, %c0_10], %11 {strides = array<i32>} : memref<1x6x32xf32, #tpu.memory_space<vmem>>, vector<1x6x32xf32>,
    return
  }
  func.func @transform_0(%arg0: i32) -> (i32, i32, i32) {
    %c0_i32 = arith.constant 0 : i32
    %c0_i32_0 = arith.constant 0 : i32
    %c0_i32_1 = arith.constant 0 : i32
    return %arg0, %c0_i32, %c0_i32_0 : i32, i32, i32
  }
  func.func @transform_1(%arg0: i32) -> (i32, i32, i32) {
    %c0_i32 = arith.constant 0 : i32
    %c0_i32_0 = arith.constant 0 : i32
    %c0_i32_1 = arith.constant 0 : i32
    return %arg0, %c0_i32, %c0_i32_0 : i32, i32, i32
  }
  func.func @transform_2(%arg0: i32) -> (i32, i32, i32) {
    %c0_i32 = arith.constant 0 : i32
    %c0_i32_0 = arith.constant 0 : i32
    %c0_i32_1 = arith.constant 0 : i32
    return %arg0, %c0_i32, %c0_i32_0 : i32, i32, i32
  }
  func.func @transform_3(%arg0: i32) -> (i32, i32, i32) {
    %c0_i32 = arith.constant 0 : i32
    %c0_i32_0 = arith.constant 0 : i32
    %c0_i32_1 = arith.constant 0 : i32
    return %arg0, %c0_i32, %c0_i32_0 : i32, i32, i32
  }
}

</mosaic_0001>

<bundles_post_ra>
// kernel: tpu_custom_call.1
= control target key start
LH: loop header
LB: loop body
LE: loop exit
PB: predicated region body
PF: predicated region fallthrough
CT: control target
= control target key end

     0   :  { %8 = vsyncpa [#allocation3], 0  ;;  %s917_s0 = inlined_call_operand.hbm [shape: f32[3,6,14], index: 0, kind: input, shape index: {}]   ;;  %s918_s1 = inlined_call_operand.hbm [shape: f32[3,14,32], index: 1, kind: input, shape index: {}]   ;;  %s919_s2 = inlined_call_operand.vmem [shape: f32[3,1,32], index: 2, kind: input, shape index: {}]   ;;  %s920_s3 = inlined_call_operand.hbm [shape: f32[3,6,32], index: 3, kind: output, shape index: {}]  }
   0x1   :  { %10 = vsyncpa [#allocation3 + $0x1], 0 }
   0x2   :  { %11 = vsyncpa [#allocation6], 0 }
   0x3   :  { %13 = vsyncpa [#allocation6 + $0x1], 0 }
   0x4   :  { %14 = vsyncpa [#allocation4], 0 }
   0x5   :  { %16 = vsyncpa [#allocation4 + $0x1], 0  ;;  %s698_s12 = smov 0   ;;  %s700_s13 = smov 0  }
   0x6   :  { %s702_s14 = smov 0   ;;  %s704_s15 = smov 0  }
   0x7 LB: > { %s719_s16 = sadd.s32 4294967295, %s667_s15   ;;  %s446_s17 = sadd.s32 4294967294, %s667_s15   ;;  %s667_s15 = sphi %s704_s15, %s937_s15   ;;  %s663_s14 = sphi %s702_s14, %s936_s14   ;;  %s659_s13 = sphi %s700_s13, %s935_s13   ;;  %s655_s12 = sphi %s698_s12, %s934_s12  }
   0x8   : > { %s723_s18 = sadd.s32 1, %s667_s15   ;;  %s29_s19 = sadd.s32 1, %s663_s14 }
   0x9   : > { %s26_s20 = ssub.s32 %s667_s15, %s723_s18  ;;  %p36_p0 = scmp.ne.s32.totalorder %s663_s14, %s659_s13 }
   0xa   : > { %p27_p1 = scmp.eq.s32.totalorder %s26_s20, 0  ;;  %p37_p2 = scmp.eq.s32.totalorder %s667_s15, 0 }
   0xb   : > { %p42_p3 = scmp.ne.s32.totalorder %s659_s13, %s655_s12  ;;  %p43_p4 = scmp.eq.s32.totalorder %s719_s16, 0 }
   0xc   : > { %s735_s21 = scalar_select %p27_p1, %s663_s14, %s29_s19  }
   0xd   : > { %p737_p5 = por %p37_p2, %p36_p0  ;;  %p741_p6 = por %p43_p4, %p42_p3 }
   0xe   : > { %p118_p7 = scmp.eq.s32.totalorder %s719_s16, 2  ;;  %p124_p8 = scmp.eq.s32.totalorder %s446_s17, 2 }
   0xf   : > { %s924_s23 = scalar_select %p741_p6, 1, 0 }
  0x10   : > { %p497_p9 = scmp.lt.s32.totalorder %s667_s15, 3  ;;  %p747_p10 = por %p118_p7, %p36_p0 }
  0x11   : > { %p751_p11 = por %p124_p8, %p42_p3  ;;  %s756_s26 = sand.u32 1, %s663_s14  }
  0x12   : > { %s925_s24 = scalar_select %p747_p10, 1, 0 }
  0x13   : > { %s926_s25 = scalar_select %p751_p11, 1, 0 }
  0x14   : > { %s450_s27 = sshll.u32 %s667_s15, 7  ;;  %s449_s28 = sshll.u32 %s756_s26, 3 }
  0x15   : > { %s763_s4 = scalar_lea.hbm %s917_s0, %s450_s27  ;;  %s148_s5 = scalar_lea.vmem [#allocation2], %s449_s28 }
  0x16   : > { %s155_s6 = sshll.u32 %s148_s5, 4  ;;  %p767_p12 = pnand %p497_p9, %p737_p5  ;;  %s771_s6 = int_to_ptr.vmem [resolvable:$true] %s155_s6 }
  0x17   : > { %s145_s8 = scalar_lea.sflag [#allocation3], %s756_s26  ;;  %s537_s9 = scalar_lea.hbm %s763_s4, 128 }
  0x18   : > { %p538_p1 = scmp.ne.s32.totalorder %s763_s4, %s537_s9  ;;  %p539_p2 = pneg %p767_p12 }
  0x19   : > { %s542_s17 = scalar_lea.hbm %s917_s0, 384  ;;  %p543_p5 = scmp.lt.u32.totalorder %s763_s4, %s917_s0 }
  0x1a   : > { %p540_p3 = pnand %p539_p2, %p538_p1  ;;  %p544_p7 = scmp.lt.u32.totalorder %s542_s17, %s537_s9 }
  0x1b   : > { %p546_p9 = scmp.lt.u32.totalorder %s537_s9, %s763_s4 }
  0x1c   : > { %p541_p4 = pneg %p540_p3  ;;  %p545_p8 = por %p544_p7, %p543_p5 }
  0x1e   : > { %p547_p13 = por %p546_p9, %p545_p8 }
  0x20   : > { %p548_p0 = pnand %p547_p13, %p541_p4 }
  0x22   : > { %551 = shalt.err (!%p548_p0)
}
  0x23   : > { %s552_s22 = scalar_lea.vmem %s771_s6, 128  ;;  %s669_s27 = smov [#allocation2]  }
  0x24   : > { %p553_p1 = scmp.ne.s32.totalorder %s771_s6, %s552_s22  ;;  %s557_s28 = sshll.u32 %s669_s27, 4  ;;  %s558_s28 = int_to_ptr.vmem [resolvable:$false] %s557_s28 }
  0x25   : > { %s559_s29 = scalar_lea.vmem %s558_s28, 256  ;;  %p560_p10 = scmp.lt.s32.totalorder %s771_s6, %s558_s28 }
  0x26   : > { %p555_p3 = pnand %p553_p1, %p539_p2  ;;  %p561_p5 = scmp.lt.s32.totalorder %s559_s29, %s552_s22 }
  0x28   : > { %p556_p11 = pneg %p555_p3  ;;  %p562_p7 = por %p561_p5, %p560_p10 }
  0x2a   : > { %p563_p8 = pnand %p562_p7, %p556_p11 }
  0x2c   : > { %566 = shalt.err (!%p563_p8)
}
  0x2d   : > { %489 = dma.hbm_to_vmem [thread:$0]  (!%p767_p12), %s763_s4, 128, %s771_s6, %s145_s8  }
  0x2e   : > { %p928_p13 = scmp.lt.s32.totalorder %s667_s15, 4  ;;  %p929_p0 = scmp.ge.s32.totalorder %s667_s15, 1 }
  0x2f   : > { %s451_s5 = sshll.u32 %s756_s26, 4  ;;  %s465_s9 = sshll.u32 %s667_s15, 8 }
  0x30   : > { %p805_p4 = pnand %p929_p0, %p928_p13  ;;  %s814_s17 = scalar_lea.hbm %s918_s1, %s465_s9 }
  0x31   : > { %s166_s19 = scalar_lea.vmem [#allocation5], %s451_s5  ;;  %s163_s4 = scalar_lea.sflag [#allocation6], %s756_s26 }
  0x32   : > { %s173_s20 = sshll.u32 %s166_s19, 4  ;;  %s567_s6 = scalar_lea.hbm %s814_s17, 256  ;;  %s816_s20 = int_to_ptr.vmem [resolvable:$true] %s173_s20 }
  0x33   : > { %p568_p10 = scmp.ne.s32.totalorder %s814_s17, %s567_s6  ;;  %s572_s27 = scalar_lea.hbm %s918_s1, 768 }
  0x34   : > { %p573_p1 = scmp.lt.u32.totalorder %s814_s17, %s918_s1  ;;  %p574_p3 = scmp.lt.u32.totalorder %s572_s27, %s567_s6 }
  0x35   : > { %p570_p11 = pnand %p568_p10, %p539_p2  ;;  %p576_p7 = scmp.lt.u32.totalorder %s567_s6, %s814_s17 }
  0x36   : > { %p575_p5 = por %p574_p3, %p573_p1 }
  0x37   : > { %p571_p9 = pneg %p570_p11 }
  0x38   : > { %p577_p8 = por %p576_p7, %p575_p5 }
  0x3a   : > { %p578_p13 = pnand %p577_p8, %p571_p9 }
  0x3c   : > { %581 = shalt.err (!%p578_p13)
}
  0x3d   : > { %s582_s5 = scalar_lea.vmem %s816_s20, 256  ;;  %s670_s9 = smov [#allocation5]  }
  0x3e   : > { %p583_p0 = scmp.ne.s32.totalorder %s816_s20, %s582_s5  ;;  %s587_s10 = sshll.u32 %s670_s9, 4  ;;  %s588_s10 = int_to_ptr.vmem [resolvable:$false] %s587_s10 }
  0x3f   : > { %s589_s11 = scalar_lea.vmem %s588_s10, 512  ;;  %p590_p6 = scmp.lt.s32.totalorder %s816_s20, %s588_s10 }
  0x40   : > { %p585_p10 = pnand %p583_p0, %p539_p2  ;;  %p591_p1 = scmp.lt.s32.totalorder %s589_s11, %s582_s5 }
  0x42   : > { %p586_p11 = pneg %p585_p10  ;;  %p592_p3 = por %p591_p1, %p590_p6 }
  0x44   : > { %p593_p5 = pnand %p592_p3, %p586_p11 }
  0x46   : > { %596 = shalt.err (!%p593_p5)
}
  0x47   : > { %s671_s19 = smov 128   ;;  %s672_s6 = smov 8  }
  0x48   : > { %492 = dma.hbm_to_vmem [thread:$0]  (!%p767_p12), %s814_s17, 256, %s816_s20, %s163_s4, %s671_s19, %s671_s19, %s672_s6  }
  0x49   : > { %191 = sbr.rel (%p805_p4) target bundleno = 319 (0x13f), region = 32  ;;  %s847_s8 = sand.u32 (!%p805_p4), 1, %s659_s13  }
  0x4a   : > { %s455_s22 = sshll.u32 (!%p805_p4), %s847_s8, 3  ;;  %s194_s27 = scalar_lea.sflag (!%p805_p4), [#allocation3], %s847_s8 }
  0x4b   : > { %s197_s28 = scalar_lea.vmem (!%p805_p4), [#allocation2], %s455_s22  ;;  %p931_p6 = scmp.ne.s32.totalorder (!%p805_p4), %s924_s23, 0 }
  0x50   : > { %642 = dma.done.wait (%p931_p6), %s194_s27, 128  }
  0x51   : > { %644 = vsyncadd (%p931_p6), %s194_s27, 4294967168  ;;  %s456_s26 = sshll.u32 %s847_s8, 4  ;;  %s203_s7 = scalar_lea.sflag [#allocation6], %s847_s8 }
  0x52   : > { %s206_s30 = scalar_lea.vmem [#allocation5], %s456_s26 }
  0x53   : > { %646 = dma.done.wait (%p931_p6), %s203_s7, 256  }
  0x54   : > { %648 = vsyncadd (%p931_p6), %s203_s7, 4294967040  ;;  %v673_v0 = vmov 0.0|0.0   ;;  %vm674_vm0 = vmmov 0   ;;  %v675_v1 = vmov 0.0   ;;  %vm254_vm1 = vcmask 1045504   ;;  %v241_v2 = vld [vmem:[%s206_s30] sm:$0xff] }
  0x55   : > { %476 = vmatprep.subr.bf16.mxu0 %v673_v0  ;;  %473 = vmatprep.mubr.msk.f32.mxu0 %vm674_vm0, %v675_v1  ;;  %v242_v3 = vld [vmem:[%s206_s30 + $0x8] sm:$0x3f]  ;;  %vm676_vm2 = vmmov 1   ;;  %vm250_vm4 = vcmask 113664   ;;  %p237_p12 = scmp.lt.s32.totalorder %s719_s16, 2  ;;  %s462_s29 = sshll.u32 %s719_s16, 7 }
  0x56   : > { %vm478_vm3 = vmpackc.low %vm254_vm1, %vm676_vm2  ;;  %v477_v4 = vpack.c.bf16 %v242_v3, %v241_v2  ;;  %v240_v5 = vld [vmem:[%s197_s28] sm:$0x3f]  ;;  %s236_s5 = scalar_lea.vmem [#allocation7], %s455_s22  ;;  %vm328_vm5 = vcmask 259072   ;;  %s874_s19 = scalar_lea.hbm %s920_s3, %s462_s29 }
  0x57   : > { %s238_s23 = scalar_select %p237_p12, %s719_s16, 2 }
  0x58   : > { %479 = vmatpush3.bf16.msk.msra.mxu0 %vm478_vm3, %v477_v4  ;;  %s344_s9 = sshll.u32 %s236_s5, 4  ;;  %s331_s6 = scalar_lea.sflag [#allocation4], %s847_s8  ;;  %s876_s9 = int_to_ptr.vmem [resolvable:$true] %s344_s9 }
  0x59   : > { %s239_s4 = scalar_lea.vmem %s919_s2, %s238_s23  ;;  %s597_s16 = scalar_lea.vmem %s876_s9, 128 }
  0x5a   : > { %v458_v6 = vld [vmem:[%s239_s4] ss:$0 sm:$0xff]  ;;  %p598_p2 = scmp.ne.s32.totalorder %s876_s9, %s597_s16  ;;  %p932_p4 = scmp.ne.s32.totalorder %s925_s24, 0 }
  0x5b   : > { %474 = vmatmul.mubr.msk.f32.vlgmr.msra.gmra.mrb[0].mxu0 %vm250_vm4, %v240_v5  ;;  %s677_s22 = smov [#allocation7]  }
  0x5c   : > { %p599_p9 = pnand %p598_p2, %p932_p4  ;;  %s601_s27 = sshll.u32 %s677_s22, 4  ;;  %s602_s27 = int_to_ptr.vmem [resolvable:$false] %s601_s27 }
  0x5d   : > { %s603_s28 = scalar_lea.vmem %s602_s27, 256  ;;  %p604_p8 = scmp.lt.s32.totalorder %s876_s9, %s602_s27 }
  0x5e   : > { %p600_p7 = pneg %p599_p9  ;;  %p605_p13 = scmp.lt.s32.totalorder %s603_s28, %s597_s16 }
  0x60   : > { %p606_p0 = por %p605_p13, %p604_p8 }
  0x62   : > { %p607_p10 = pnand %p606_p0, %p600_p7 }
 0x12e   : > { %v324_v7 = vpop.f32.mrb[0].mxu0 }
 0x12f   : > { %v325_v8 = vadd.f32 %v458_v6, %v324_v7  ;;  %v475_v9 = vpop.f32.mrb[1].mxu0 }
 0x131   : > { %329 = vst.msk [vmem:[%s236_s5] sm:$0x3f] %vm328_vm5, %v325_v8 }
 0x132   : > { %610 = shalt.err (!%p607_p10)
}
 0x133   : > { %s611_s8 = scalar_lea.hbm %s874_s19, 128  ;;  %s615_s30 = scalar_lea.hbm %s920_s3, 384 }
 0x134   : > { %p612_p11 = scmp.ne.s32.totalorder %s874_s19, %s611_s8  ;;  %p616_p5 = scmp.lt.u32.totalorder %s874_s19, %s920_s3 }
 0x135   : > { %p617_p6 = scmp.lt.u32.totalorder %s615_s30, %s611_s8  ;;  %p619_p2 = scmp.lt.u32.totalorder %s611_s8, %s874_s19 }
 0x136   : > { %p613_p1 = pnand %p612_p11, %p932_p4 }
 0x137   : > { %p618_p12 = por %p617_p6, %p616_p5 }
 0x138   : > { %p614_p3 = pneg %p613_p1 }
 0x139   : > { %p620_p9 = por %p619_p2, %p618_p12 }
 0x13b   : > { %p621_p7 = pnand %p620_p9, %p614_p3 }
 0x13d   : > { %624 = shalt.err (!%p621_p7)
}
 0x13e   : > { %484 = dma.vmem_to_hbm [thread:$0]  (%p932_p4), %s876_s9, 128, %s874_s19, %s331_s6  }
 0x13f PF: > { %p498_p8 = scmp.ge.s32.totalorder %s667_s15, 2  ;;  %s356_s20 = sand.u32 1, %s655_s12  }
 0x140   : > { %p933_p13 = scmp.ne.s32.totalorder %s926_s25, 0  ;;  %s357_s4 = scalar_lea.sflag [#allocation4], %s356_s20 }
 0x142   : > { %p494_p0 = pnand %p498_p8, %p933_p13 }
 0x144   : > { %650 = dma.done.wait (!%p494_p0), %s357_s4, 128  }
 0x145   : > { %652 = vsyncadd (!%p494_p0), %s357_s4, 4294967168  ;;  %p19_p10 = scmp.ge.s32.totalorder %s723_s18, 5   ;;  %s934_s12 = smov %s659_s13 }
 0x146   : > { %s935_s13 = smov %s663_s14  ;;  %s936_s14 = smov %s735_s21 }
 0x147   : > { %s937_s15 = smov %s723_s18  ;;  %21 = sbr.rel (!%p19_p10) target bundleno = 7 (0x7), region = 93 }
 0x14e   :  { %362 = vsyncpa [#allocation3], 1 }
 0x14f   :  { %364 = vsyncpa [#allocation3 + $0x1], 1 }
 0x150   :  { %365 = vsyncpa [#allocation6], 1 }
 0x151   :  { %367 = vsyncpa [#allocation6 + $0x1], 1 }
 0x152   :  { %368 = vsyncpa [#allocation4], 1 }
 0x153   :  { %370 = vsyncpa [#allocation4 + $0x1], 1 }

</bundles_post_ra>
